<compile_context>
chip_gen: v6e
topology: v6e:2x2x1
jax: 0.10.0
libtpu: 0.0.40
codegen_flags: <defaults>
</compile_context>

<pallas_src>
from typing import Dict, NamedTuple

import jax
import jax.numpy as jnp
from jax.experimental import pallas as pl
from jax.experimental.pallas import tpu as pltpu

CPAD = 128                       # lane-dense width of all stored activations
TM_MAX = 2048                    # max rows per tile
VMEM_LIMIT = 48 * 1024 * 1024    # explicit scoped-VMEM ceiling (fits all gens)


class NestedTensor(NamedTuple):
    tensors: jax.Array   # NCHW features (float32)
    mask: jax.Array      # (N, h, w) bool


# ----------------------------------------------------------------------------
# Pallas kernels
# ----------------------------------------------------------------------------
def _stem_l1_l2_kernel(x_ref, w0_ref, b0_ref, w1_ref, b1_ref, w2_ref, b2_ref,
                       o_ref):
    """Fused stem + layer1 + layer2.  Rows are stride-8 pixels; stem/layer1
    weights are block-diagonal over the 4 stride-4 sub-positions so a single
    matmul chain handles all of them.  bf16 operands on the MXU, f32
    accumulation, f32 bias/ReLU epilogues, lane-dense (128) bf16 store."""
    h = jnp.dot(x_ref[...], w0_ref[...], preferred_element_type=jnp.float32)
    h = jnp.maximum(h + b0_ref[...], 0.0).astype(jnp.bfloat16)          # stem
    h = jnp.dot(h, w1_ref[...], preferred_element_type=jnp.float32)
    h = jnp.maximum(h + b1_ref[...], 0.0).astype(jnp.bfloat16)          # layer1
    y = jnp.dot(h, w2_ref[...], preferred_element_type=jnp.float32)
    o_ref[...] = jnp.maximum(y + b2_ref[...], 0.0).astype(o_ref.dtype)  # layer2


def _l3_l4_fused_kernel(x_ref, w3_ref, b3_ref, w4_ref, b4_ref, o_ref):
    """Fused layer3 + layer4 tail.  x_ref is (4[e], 4[f], tc, 128): both 2x2
    spatial regroups are static leading-dim indexing on the VMEM block, so the
    layer3 intermediate never leaves VMEM/registers."""
    tc = x_ref.shape[2]
    acc4 = jnp.zeros((tc, o_ref.shape[1]), jnp.float32)
    for f in range(4):                       # stride-16 position inside stride-32
        acc3 = jnp.zeros((tc, w3_ref.shape[2]), jnp.float32)
        for e in range(4):                   # stride-8 position inside stride-16
            acc3 += jnp.dot(x_ref[e, f], w3_ref[e],
                            preferred_element_type=jnp.float32)
        h3 = jnp.maximum(acc3 + b3_ref[...], 0.0).astype(jnp.bfloat16)
        acc4 += jnp.dot(h3, w4_ref[f], preferred_element_type=jnp.float32)
    o_ref[...] = jnp.maximum(acc4 + b4_ref[...], 0.0).astype(o_ref.dtype)


def _group_conv_kernel(x_ref, w_ref, b_ref, o_ref):
    """One k=2,s=2 conv stage as a grouped matmul: x_ref is (4[g], tb, 128);
    the 2x2 spatial regroup is the leading dim.  Used only for the un-fused
    tail when layer3 itself has to be materialized as a returned feature."""
    acc = jnp.zeros((x_ref.shape[1], o_ref.shape[1]), jnp.float32)
    for g in range(x_ref.shape[0]):
        acc += jnp.dot(x_ref[g], w_ref[g], preferred_element_type=jnp.float32)
    o_ref[...] = jnp.maximum(acc + b_ref[...], 0.0).astype(o_ref.dtype)


# ----------------------------------------------------------------------------
# Tiling policy + pallas_call wrappers
# ----------------------------------------------------------------------------
def _tile_rows(m: int, tm_max: int = TM_MAX, min_steps: int = 4) -> int:
    """Row-tile chooser.  Always returns a tile that divides m exactly (so no
    host-side pad / slice passes) and is a multiple of 16 rows (bf16 sublane
    packing) or the full row count (always-legal block).  Prefers >=min_steps
    grid steps so both v7x TensorCores keep a pipelined loop, but never
    shrinks tiles below 128 rows for it (v5e/v6e: maximal tiles amortize the
    ~0.35us per-step overhead)."""
    cap = min(m, tm_max)
    cands = [d for d in range(16, cap + 1, 16) if m % d == 0]
    if not cands:
        cands = [d for d in range(8, cap + 1, 8) if m % d == 0]
    if (m <= tm_max or not cands) and m <= 4096:
        cands.append(m)                      # full-dim block is always legal
    if not cands:                            # pathological shapes only
        cands = [d for d in range(1, cap + 1) if m % d == 0]
    best = max(cands)
    if m // best < min_steps:
        stepped = [d for d in cands if m // d >= min_steps and d >= 128]
        if stepped:
            best = max(stepped)
    return best


def _mosaic_params() -> pltpu.CompilerParams:
    return pltpu.CompilerParams(dimension_semantics=("parallel",),
                                vmem_limit_bytes=VMEM_LIMIT)


def fused_stem_l1_l2(x2d, w0, b0, w1, b1, w2, b2):
    """x2d: (M8, 64*in_ch) bf16 rows of stride-8 pixels -> (M8, 128) bf16
    with lanes [:32] = layer2 features."""
    m, k = x2d.shape
    tm = _tile_rows(m)
    return pl.pallas_call(
        _stem_l1_l2_kernel,
        out_shape=jax.ShapeDtypeStruct((m, CPAD), jnp.bfloat16),
        grid_spec=pltpu.PrefetchScalarGridSpec(
            num_scalar_prefetch=0,
            grid=(m // tm,),
            in_specs=[
                pl.BlockSpec((tm, k), lambda i: (i, 0)),
                pl.BlockSpec(w0.shape, lambda i: (0, 0)),
                pl.BlockSpec(b0.shape, lambda i: (0, 0)),
                pl.BlockSpec(w1.shape, lambda i: (0, 0)),
                pl.BlockSpec(b1.shape, lambda i: (0, 0)),
                pl.BlockSpec(w2.shape, lambda i: (0, 0)),
                pl.BlockSpec(b2.shape, lambda i: (0, 0)),
            ],
            out_specs=pl.BlockSpec((tm, CPAD), lambda i: (i, 0))),
        compiler_params=_mosaic_params(),
    )(x2d, w0, b0, w1, b1, w2, b2)


def fused_l3_l4(x4d, w3, b3, w4, b4):
    """x4d: (4, 4, M32, 128) bf16 -> (M32, 128) bf16, lanes [:64] = layer4."""
    m = x4d.shape[2]
    tc = _tile_rows(m)
    return pl.pallas_call(
        _l3_l4_fused_kernel,
        out_shape=jax.ShapeDtypeStruct((m, CPAD), jnp.bfloat16),
        grid_spec=pltpu.PrefetchScalarGridSpec(
            num_scalar_prefetch=0,
            grid=(m // tc,),
            in_specs=[
                pl.BlockSpec((4, 4, tc, CPAD), lambda i: (0, 0, i, 0)),
                pl.BlockSpec(w3.shape, lambda i: (0, 0, 0)),
                pl.BlockSpec(b3.shape, lambda i: (0, 0)),
                pl.BlockSpec(w4.shape, lambda i: (0, 0, 0)),
                pl.BlockSpec(b4.shape, lambda i: (0, 0)),
            ],
            out_specs=pl.BlockSpec((tc, CPAD), lambda i: (i, 0))),
        compiler_params=_mosaic_params(),
    )(x4d, w3, b3, w4, b4)


def group_conv(x3d, w, b):
    """x3d: (4, M, 128) bf16, w: (4, 128, C) bf16, b: (1, C) f32 -> (M, C)."""
    m = x3d.shape[1]
    cout = w.shape[2]
    tb = _tile_rows(m)
    return pl.pallas_call(
        _group_conv_kernel,
        out_shape=jax.ShapeDtypeStruct((m, cout), jnp.bfloat16),
        grid_spec=pltpu.PrefetchScalarGridSpec(
            num_scalar_prefetch=0,
            grid=(m // tb,),
            in_specs=[
                pl.BlockSpec((4, tb, x3d.shape[2]), lambda i: (0, i, 0)),
                pl.BlockSpec(w.shape, lambda i: (0, 0, 0)),
                pl.BlockSpec(b.shape, lambda i: (0, 0)),
            ],
            out_specs=pl.BlockSpec((tb, cout), lambda i: (i, 0))),
        compiler_params=_mosaic_params(),
    )(x3d, w, b)


# ----------------------------------------------------------------------------
# Glue helpers (tiny gathers / index plumbing only; no hot-path compute)
# ----------------------------------------------------------------------------
def nearest_downsample_mask(mask: jax.Array, out_h: int, out_w: int) -> jax.Array:
    """F.interpolate(m[None].float(), size=(h, w)).to(bool)[0] with PyTorch's
    default mode='nearest' (src = floor(dst * in / out))."""
    # TODO(synk): mask nearest-interpolation is a tiny gather; kept in JAX glue.
    _, in_h, in_w = mask.shape
    ih = (jnp.arange(out_h) * in_h) // out_h
    iw = (jnp.arange(out_w) * in_w) // out_w
    m = mask.astype(jnp.float32)[:, ih[:, None], iw[None, :]]
    return m.astype(jnp.bool_)


# ----------------------------------------------------------------------------
# BackboneBase equivalent (synthetic ResNet-like body, total stride 32)
# ----------------------------------------------------------------------------
class BackboneBase:
    # valid (un-padded) output channels of the synthetic stages
    C_STEM, C_L1, C_L2, C_L3, C_L4 = 16, 16, 32, 48, 64

    def __init__(self, key, in_ch=3, train_backbone=False,
                 return_interm_layers=False, out_indices=(3,),
                 num_channels=(32, 48, 64)):
        # --- bookkeeping identical to the PyTorch __init__ ---
        num_channels = list(num_channels)
        if return_interm_layers:
            strides = [8, 16, 32]
            self.return_layers = {}
            self.strides = []
            self.num_channels = []
            for i, idx in enumerate(out_indices):
                self.return_layers[f"layer{idx}"] = str(i)
                self.strides.append(strides[idx - 2])
                self.num_channels.append(num_channels[idx - 2])
        else:
            self.return_layers = {"layer4": "0"}
            self.strides = [32]
            self.num_channels = num_channels[-1]

        # --- deterministic synthetic backbone parameters ---
        # (train_backbone only toggles requires_grad in PyTorch; no-op here.)
        # Dense per-stage weights are packed into the fused-kernel layouts:
        # stem/layer1 block-diagonal over the 4 stride-4 positions, layer3/4
        # grouped over the 2x2 positions (leading dim of a (4, K, C) weight).
        self.in_ch = in_ch
        ks = jax.random.split(key, 5)

        def dense(k, fan_in, cout):
            w = jax.random.normal(k, (fan_in, cout), dtype=jnp.float32)
            return w * (1.0 / jnp.sqrt(jnp.float32(fan_in)))

        w_stem = dense(ks[0], 16 * in_ch, self.C_STEM)   # rows ordered (ry,rx,c)
        w_l1 = dense(ks[1], self.C_STEM, self.C_L1)
        w_l2 = dense(ks[2], 4 * self.C_L1, self.C_L2)    # rows ordered (ay,ax,c1)
        w_l3 = dense(ks[3], 4 * self.C_L2, self.C_L3)    # rows ordered (ey,ex,c2)
        w_l4 = dense(ks[4], 4 * self.C_L3, self.C_L4)    # rows ordered (fy,fx,c3)

        def block_diag4(wd):
            kk, cc = wd.shape
            out = jnp.zeros((4 * kk, 4 * cc), jnp.float32)
            for p in range(4):
                out = out.at[p * kk:(p + 1) * kk, p * cc:(p + 1) * cc].set(wd)
            return out

        # kernel A: stem + layer1 + layer2 at stride-8 rows
        self.wA0 = block_diag4(w_stem).astype(jnp.bfloat16)       # (64*in_ch, 64)
        self.bA0 = jnp.zeros((1, 4 * self.C_STEM), jnp.float32)
        self.wA1 = block_diag4(w_l1).astype(jnp.bfloat16)         # (64, 64)
        self.bA1 = jnp.zeros((1, 4 * self.C_L1), jnp.float32)
        self.wA2 = (jnp.zeros((4 * self.C_L1, CPAD), jnp.float32)
                    .at[:, :self.C_L2].set(w_l2)).astype(jnp.bfloat16)
        self.bA2 = jnp.zeros((1, CPAD), jnp.float32)

        # kernel B: layer3 + layer4 grouped over the 2x2 positions
        w3g = jnp.zeros((4, CPAD, self.C_L3), jnp.float32)
        w4g = jnp.zeros((4, self.C_L3, CPAD), jnp.float32)
        for p in range(4):
            w3g = w3g.at[p, :self.C_L2, :].set(
                w_l3[p * self.C_L2:(p + 1) * self.C_L2, :])
            w4g = w4g.at[p, :, :self.C_L4].set(
                w_l4[p * self.C_L3:(p + 1) * self.C_L3, :])
        self.w3g = w3g.astype(jnp.bfloat16)
        self.b3 = jnp.zeros((1, self.C_L3), jnp.float32)
        self.w4g = w4g.astype(jnp.bfloat16)
        self.b4 = jnp.zeros((1, CPAD), jnp.float32)

        # un-fused tail weights (128-lane outputs) only when layer3 itself is
        # a requested feature map (then it must be materialized in HBM).
        self._need_l3_out = "layer3" in self.return_layers
        if self._need_l3_out:
            w3w = jnp.zeros((4, CPAD, CPAD), jnp.float32)
            w4w = jnp.zeros((4, CPAD, CPAD), jnp.float32)
            for p in range(4):
                w3w = w3w.at[p, :self.C_L2, :self.C_L3].set(
                    w_l3[p * self.C_L2:(p + 1) * self.C_L2, :])
                w4w = w4w.at[p, :self.C_L3, :self.C_L4].set(
                    w_l4[p * self.C_L3:(p + 1) * self.C_L3, :])
            self.w3w = w3w.astype(jnp.bfloat16)
            self.b3w = jnp.zeros((1, CPAD), jnp.float32)
            self.w4w = w4w.astype(jnp.bfloat16)

    def forward(self, tensors: jax.Array, mask: jax.Array) -> Dict[str, NestedTensor]:
        """tensors: (N, C, H, W) float32, mask: (N, H, W) bool."""
        n, c, h, w = tensors.shape
        assert c == self.in_ch and h % 32 == 0 and w % 32 == 0
        h32, w32 = h // 32, w // 32
        m32 = n * h32 * w32

        # One composed transpose/reshape (cast last so XLA fuses it): NCHW ->
        # rows of stride-8 pixels in nested (ey,ex, fy,fx, n,y32,x32) order,
        # lanes (ay,ax, ry,rx, c).  All later 2x2 spatial regroups become pure
        # leading-dim reshapes, so no space_to_depth HBM passes remain.
        x = tensors.reshape(n, c, h32, 2, 2, 2, 4, w32, 2, 2, 2, 4)
        #                   n  c y32 fy ey ay ry w32 fx ex ax rx
        x = jnp.transpose(x, (4, 9, 3, 8, 0, 2, 7, 5, 10, 6, 11, 1))
        #                   ey ex fy fx n y32 x32 ay ax ry rx c
        x = x.reshape(16 * m32, 64 * c).astype(jnp.bfloat16)

        a_out = fused_stem_l1_l2(x, self.wA0, self.bA0, self.wA1, self.bA1,
                                 self.wA2, self.bA2)
        # a_out rows: (ey,ex, fy,fx, n,y32,x32); lanes [:32] = layer2 features.

        feats: Dict[str, jax.Array] = {}

        if "layer2" in self.return_layers:
            f2 = a_out[:, :self.C_L2].astype(jnp.float32)
            f2 = f2.reshape(2, 2, 2, 2, n, h32, w32, self.C_L2)
            f2 = jnp.transpose(f2, (4, 7, 5, 2, 0, 6, 3, 1))
            feats[self.return_layers["layer2"]] = f2.reshape(
                n, self.C_L2, h // 8, w // 8)

        need_l4 = "layer4" in self.return_layers
        if self._need_l3_out or need_l4:
            if self._need_l3_out:
                # un-fused tail: layer3 must be materialized as an output.
                l3 = group_conv(a_out.reshape(4, 4 * m32, CPAD),
                                self.w3w, self.b3w)
                f3 = l3[:, :self.C_L3].astype(jnp.float32)
                f3 = f3.reshape(2, 2, n, h32, w32, self.C_L3)
                f3 = jnp.transpose(f3, (2, 5, 3, 0, 4, 1))
                feats[self.return_layers["layer3"]] = f3.reshape(
                    n, self.C_L3, h // 16, w // 16)
                l4 = group_conv(l3.reshape(4, m32, CPAD), self.w4w, self.b4)
            else:
                l4 = fused_l3_l4(a_out.reshape(4, 4, m32, CPAD),
                                 self.w3g, self.b3, self.w4g, self.b4)
            if need_l4:
                f4 = l4[:, :self.C_L4].astype(jnp.float32)
                f4 = jnp.transpose(f4.reshape(n, h32, w32, self.C_L4),
                                   (0, 3, 1, 2))
                feats[self.return_layers["layer4"]] = f4

        out: Dict[str, NestedTensor] = {}
        for key_name, f in feats.items():
            m = nearest_downsample_mask(mask, f.shape[2], f.shape[3])
            out[key_name] = NestedTensor(f, m)
        return out


if __name__ == "__main__":
    key = jax.random.PRNGKey(0)
    k_param, k_x = jax.random.split(key)

    N, C, H, W = 2, 3, 64, 64
    x = jax.random.normal(k_x, (N, C, H, W), dtype=jnp.float32)
    # DETR-style padding mask: True = padded pixel
    mask = jnp.zeros((N, H, W), dtype=jnp.bool_).at[:, :, W // 2:].set(True)

    backbone = BackboneBase(k_param, in_ch=C, train_backbone=False,
                            return_interm_layers=False,
                            out_indices=[3], num_channels=[32, 48, 64])

    out = backbone.forward(x, mask)

    for name, nt in out.items():
        jax.block_until_ready(nt.tensors)
        jax.block_until_ready(nt.mask)
        assert nt.tensors.shape == (N, backbone.num_channels, H // 32, W // 32)
        assert nt.tensors.dtype == jnp.float32
        assert nt.mask.shape == (N, H // 32, W // 32)
        assert nt.mask.dtype == jnp.bool_
        assert bool(jnp.all(jnp.isfinite(nt.tensors)))

    print("KERNEL_OK")
</pallas_src>

<mosaic_0001>
module attributes {stable_mosaic.version = 11 : i64} {
  func.func @_stem_l1_l2_kernel(%arg0: i32, %arg1: memref<128x192xbf16, #tpu.memory_space<vmem>>, %arg2: memref<192x64xbf16, #tpu.memory_space<vmem>>, %arg3: memref<1x64xf32, #tpu.memory_space<vmem>>, %arg4: memref<64x64xbf16, #tpu.memory_space<vmem>>, %arg5: memref<1x64xf32, #tpu.memory_space<vmem>>, %arg6: memref<64x128xbf16, #tpu.memory_space<vmem>>, %arg7: memref<1x128xf32, #tpu.memory_space<vmem>>, %arg8: memref<128x128xbf16, #tpu.memory_space<vmem>>) attributes {dimension_semantics = [#tpu.dimension_semantics<parallel>], iteration_bounds = array<i64: 1>, scalar_prefetch = 0 : i64, scratch_operands = 0 : i64, tpu.core_type = #tpu.core_type<tc>, window_params = [{transform_indices = @transform_0, window_bounds = array<i64: 128, 192>}, {pipeline_mode = #tpu.pipeline_mode<synchronous>, transform_indices = @transform_1, window_bounds = array<i64: 192, 64>}, {pipeline_mode = #tpu.pipeline_mode<synchronous>, transform_indices = @transform_2, window_bounds = array<i64: 1, 64>}, {pipeline_mode = #tpu.pipeline_mode<synchronous>, transform_indices = @transform_3, window_bounds = array<i64: 64, 64>}, {pipeline_mode = #tpu.pipeline_mode<synchronous>, transform_indices = @transform_4, window_bounds = array<i64: 1, 64>}, {pipeline_mode = #tpu.pipeline_mode<synchronous>, transform_indices = @transform_5, window_bounds = array<i64: 64, 128>}, {pipeline_mode = #tpu.pipeline_mode<synchronous>, transform_indices = @transform_6, window_bounds = array<i64: 1, 128>}, {transform_indices = @transform_7, window_bounds = array<i64: 128, 128>}]} {
    %c0 = arith.constant 0 : index
    %c0_0 = arith.constant 0 : index
    %0 = vector.load %arg1[%c0, %c0_0] : memref<128x192xbf16, #tpu.memory_space<vmem>>, vector<128x192xbf16>
    %c0_1 = arith.constant 0 : index
    %c0_2 = arith.constant 0 : index
    %1 = vector.load %arg2[%c0_1, %c0_2] : memref<192x64xbf16, #tpu.memory_space<vmem>>, vector<192x64xbf16>
    %cst = arith.constant dense<0.000000e+00> : vector<128x64xf32>
    %2 = tpu.matmul %0, %1, %cst {dimension_numbers = #tpu.dot_dimension_numbers<[1], [0], [0], [1], [0, 0, 1, 1], [], []>} : vector<128x192xbf16>, vector<192x64xbf16>, vector<128x64xf32> -> vector<128x64xf32>
    %c0_3 = arith.constant 0 : index
    %c0_4 = arith.constant 0 : index
    %3 = vector.load %arg3[%c0_3, %c0_4] : memref<1x64xf32, #tpu.memory_space<vmem>>, vector<1x64xf32>
    %4 = vector.broadcast %3 : vector<1x64xf32> to vector<128x64xf32>
    %5 = arith.addf %2, %4 : vector<128x64xf32>
    %cst_5 = arith.constant 0.000000e+00 : f32
    %6 = vector.broadcast %cst_5 : f32 to vector<128x64xf32>
    %7 = arith.maximumf %5, %6 : vector<128x64xf32>
    %8 = arith.truncf %7 : vector<128x64xf32> to vector<128x64xbf16>
    %c0_6 = arith.constant 0 : index
    %c0_7 = arith.constant 0 : index
    %9 = vector.load %arg4[%c0_6, %c0_7] : memref<64x64xbf16, #tpu.memory_space<vmem>>, vector<64x64xbf16>
    %cst_8 = arith.constant dense<0.000000e+00> : vector<128x64xf32>
    %10 = tpu.matmul %8, %9, %cst_8 {dimension_numbers = #tpu.dot_dimension_numbers<[1], [0], [0], [1], [0, 0, 1, 1], [], []>} : vector<128x64xbf16>, vector<64x64xbf16>, vector<128x64xf32> -> vector<128x64xf32>
    %c0_9 = arith.constant 0 : index
    %c0_10 = arith.constant 0 : index
    %11 = vector.load %arg5[%c0_9, %c0_10] : memref<1x64xf32, #tpu.memory_space<vmem>>, vector<1x64xf32>
    %12 = vector.broadcast %11 : vector<1x64xf32> to vector<128x64xf32>
    %13 = arith.addf %10, %12 : vector<128x64xf32>
    %cst_11 = arith.constant 0.000000e+00 : f32
    %14 = vector.broadcast %cst_11 : f32 to vector<128x64xf32>
    %15 = arith.maximumf %13, %14 : vector<128x64xf32>
    %16 = arith.truncf %15 : vector<128x64xf32> to vector<128x64xbf16>
    %c0_12 = arith.constant 0 : index
    %c0_13 = arith.constant 0 : index
    %17 = vector.load %arg6[%c0_12, %c0_13] : memref<64x128xbf16, #tpu.memory_space<vmem>>, vector<64x128xbf16>
    %cst_14 = arith.constant dense<0.000000e+00> : vector<128x128xf32>
    %18 = tpu.matmul %16, %17, %cst_14 {dimension_numbers = #tpu.dot_dimension_numbers<[1], [0], [0], [1], [0, 0, 1, 1], [], []>} : vector<128x64xbf16>, vector<64x128xbf16>, vector<128x128xf32> -> vector<128x128xf32>
    %c0_15 = arith.constant 0 : index
    %c0_16 = arith.constant 0 : index
    %19 = vector.load %arg7[%c0_15, %c0_16] : memref<1x128xf32, #tpu.memory_space<vmem>>, vector<1x128xf32>
    %20 = vector.broadcast %19 : vector<1x128xf32> to vector<128x128xf32>
    %21 = arith.addf %18, %20 : vector<128x128xf32>
    %cst_17 = arith.constant 0.000000e+00 : f32
    %22 = vector.broadcast %cst_17 : f32 to vector<128x128xf32>
    %23 = arith.maximumf %21, %22 : vector<128x128xf32>
    %24 = arith.truncf %23 : vector<128x128xf32> to vector<128x128xbf16>
    %c0_18 = arith.constant 0 : index
    %c0_19 = arith.constant 0 : index
    %25 = vector.load %arg8[%c0_18, %c0_19] : memref<128x128xbf16, #tpu.memory_space<vmem>>, vector<128x128xbf16>
    tpu.vector_store %arg8[%c0_18, %c0_19], %24 {strides = array<i32>} : memref<128x128xbf16, #tpu.memory_space<vmem>>, vector<128x128xbf16>,
    return
  }
  func.func @transform_0(%arg0: i32) -> (i32, i32) {
    %c0_i32 = arith.constant 0 : i32
    %c0_i32_0 = arith.constant 0 : i32
    return %arg0, %c0_i32 : i32, i32
  }
  func.func @transform_1(%arg0: i32) -> (i32, i32) {
    %c0_i32 = arith.constant 0 : i32
    %c0_i32_0 = arith.constant 0 : i32
    %c0_i32_1 = arith.constant 0 : i32
    return %c0_i32, %c0_i32_0 : i32, i32
  }
  func.func @transform_2(%arg0: i32) -> (i32, i32) {
    %c0_i32 = arith.constant 0 : i32
    %c0_i32_0 = arith.constant 0 : i32
    %c0_i32_1 = arith.constant 0 : i32
    return %c0_i32, %c0_i32_0 : i32, i32
  }
  func.func @transform_3(%arg0: i32) -> (i32, i32) {
    %c0_i32 = arith.constant 0 : i32
    %c0_i32_0 = arith.constant 0 : i32
    %c0_i32_1 = arith.constant 0 : i32
    return %c0_i32, %c0_i32_0 : i32, i32
  }
  func.func @transform_4(%arg0: i32) -> (i32, i32) {
    %c0_i32 = arith.constant 0 : i32
    %c0_i32_0 = arith.constant 0 : i32
    %c0_i32_1 = arith.constant 0 : i32
    return %c0_i32, %c0_i32_0 : i32, i32
  }
  func.func @transform_5(%arg0: i32) -> (i32, i32) {
    %c0_i32 = arith.constant 0 : i32
    %c0_i32_0 = arith.constant 0 : i32
    %c0_i32_1 = arith.constant 0 : i32
    return %c0_i32, %c0_i32_0 : i32, i32
  }
  func.func @transform_6(%arg0: i32) -> (i32, i32) {
    %c0_i32 = arith.constant 0 : i32
    %c0_i32_0 = arith.constant 0 : i32
    %c0_i32_1 = arith.constant 0 : i32
    return %c0_i32, %c0_i32_0 : i32, i32
  }
  func.func @transform_7(%arg0: i32) -> (i32, i32) {
    %c0_i32 = arith.constant 0 : i32
    %c0_i32_0 = arith.constant 0 : i32
    return %arg0, %c0_i32 : i32, i32
  }
}

</mosaic_0001>

<bundles_post_ra>
// kernel: tpu_custom_call.1
= control target key start
LH: loop header
LB: loop body
LE: loop exit
PB: predicated region body
PF: predicated region fallthrough
CT: control target
= control target key end

     0   :  { %v1105_v1 = vmov 0   ;;  %vm219_vm0 = vcmask 523264   ;;  %s1311_s0 = inlined_call_operand.vmem [shape: bf16[128,192], index: 0, kind: input, shape index: {}]   ;;  %s1312_s1 = inlined_call_operand.vmem [shape: bf16[192,64], index: 1, kind: input, shape index: {}]   ;;  %s1313_s2 = inlined_call_operand.vmem [shape: f32[1,64], index: 2, kind: input, shape index: {}]   ;;  %s1314_s3 = inlined_call_operand.vmem [shape: bf16[64,64], index: 3, kind: input, shape index: {}]   ;;  %s1315_s4 = inlined_call_operand.vmem [shape: f32[1,64], index: 4, kind: input, shape index: {}]   ;;  %s1316_s5 = inlined_call_operand.vmem [shape: bf16[64,128], index: 5, kind: input, shape index: {}]   ;;  %s1317_s6 = inlined_call_operand.vmem [shape: f32[1,128], index: 6, kind: input, shape index: {}]   ;;  %s1318_s7 = inlined_call_operand.hbm [shape: bf16[128,128], index: 7, kind: output, shape index: {}]  }
   0x1   :  { %v1039_v0 = vld [vmem:[%s1312_s1 + $0x38] sm:$0xff]   ;;  %244 = vmatprep.subr.bf16.mxu0 %v1105_v1  ;;  %v1040_v2 = vld [vmem:[%s1312_s1 + $0x30] sm:$0xff]   ;;  %v1041_v3 = vld [vmem:[%s1312_s1 + $0x28] sm:$0xff]  }
   0x2   :  { %245 = vmatpush1.bf16.msra.mxu0 %v1039_v0  ;;  %v1042_v4 = vld [vmem:[%s1312_s1 + $0x20] sm:$0xff]   ;;  %v1043_v6 = vld [vmem:[%s1312_s1 + $0x18] sm:$0xff]   ;;  %v1044_v7 = vld [vmem:[%s1312_s1 + $0x10] sm:$0xff]  }
   0x3   :  { %246 = vmatprep.subr.bf16.mxu0 %v1105_v1  ;;  %v1053_v5 = vld [vmem:[%s1311_s0 + $0x4] ss:$8 sps:$4 sm:$0xff]  }
   0x4   :  { %850 = vmatprep.mubr.msk.bf16.mxu0 %vm219_vm0, %v1053_v5  ;;  %v1045_v8 = vld [vmem:[%s1312_s1 + $0x8] sm:$0xff]   ;;  %v1046_v9 = vld [vmem:[%s1312_s1] sm:$0xff]  }
   0x6   :  { %247 = vmatpush1.bf16.msra.mxu0 %v1040_v2 }
   0x7   :  { %248 = vmatprep.subr.bf16.mxu0 %v1105_v1 }
   0xa   :  { %249 = vmatpush1.bf16.msra.mxu0 %v1041_v3 }
   0xb   :  { %250 = vmatprep.subr.bf16.mxu0 %v1105_v1 }
   0xe   :  { %251 = vmatpush1.bf16.msra.mxu0 %v1042_v4 }
   0xf   :  { %252 = vmatprep.subr.bf16.mxu0 %v1105_v1 }
  0x12   :  { %253 = vmatpush1.bf16.msra.mxu0 %v1043_v6 }
  0x13   :  { %254 = vmatprep.subr.bf16.mxu0 %v1105_v1 }
  0x16   :  { %255 = vmatpush1.bf16.msra.mxu0 %v1044_v7 }
  0x17   :  { %256 = vmatprep.subr.bf16.mxu0 %v1105_v1 }
  0x1a   :  { %257 = vmatpush1.bf16.msra.mxu0 %v1045_v8 }
  0x1b   :  { %258 = vmatprep.subr.bf16.mxu0 %v1105_v1 }
  0x1c   :  { %12 = vsyncpa [#allocation3], 0  ;;  %v1047_v10 = vld [vmem:[%s1312_s1 + $0x58] sm:$0xff]   ;;  %v1048_v11 = vld [vmem:[%s1312_s1 + $0x50] sm:$0xff]  }
  0x1d   :  { %v1049_v12 = vld [vmem:[%s1312_s1 + $0x48] sm:$0xff]   ;;  %v1050_v13 = vld [vmem:[%s1312_s1 + $0x40] sm:$0xff]   ;;  %v1054_v15 = vld [vmem:[%s1311_s0 + $0x14] ss:$8 sps:$4 sm:$0xff]  }
  0x1e   :  { %259 = vmatpush1.bf16.msra.mxu0 %v1046_v9  ;;  %v1051_v14 = vld [vmem:[%s1311_s0] ss:$8 sps:$4 sm:$0xff]   ;;  %v1056_v16 = vld [vmem:[%s1311_s0 + $0x10] ss:$8 sps:$4 sm:$0xff]   ;;  %v1057_v17 = vld [vmem:[%s1311_s0 + $0x24] ss:$8 sps:$4 sm:$0xff]  }
  0x1f   :  { %268 = vmatprep.subr.bf16.mxu0 %v1105_v1  ;;  %v1059_v18 = vld [vmem:[%s1311_s0 + $0x20] ss:$8 sps:$4 sm:$0xff]   ;;  %v1060_v19 = vld [vmem:[%s1311_s0 + $0x34] ss:$8 sps:$4 sm:$0xff]   ;;  %v1062_v20 = vld [vmem:[%s1311_s0 + $0x30] ss:$8 sps:$4 sm:$0xff]  }
  0x20   :  { %v1063_v21 = vld [vmem:[%s1311_s0 + $0x44] ss:$8 sps:$4 sm:$0xff]   ;;  %v1065_v22 = vld [vmem:[%s1311_s0 + $0x40] ss:$8 sps:$4 sm:$0xff]   ;;  %v1066_v23 = vld [vmem:[%s1311_s0 + $0x54] ss:$8 sps:$4 sm:$0xff]  }
  0x21   :  { %v1068_v24 = vld [vmem:[%s1311_s0 + $0x50] ss:$8 sps:$4 sm:$0xff]   ;;  %v1069_v25 = vld [vmem:[%s1311_s0 + $0x64] ss:$8 sps:$4 sm:$0xff]   ;;  %v1071_v26 = vld [vmem:[%s1311_s0 + $0x60] ss:$8 sps:$4 sm:$0xff]  }
  0x22   :  { %269 = vmatpush2.bf16.msra.mxu0 %v1047_v10  ;;  %v1072_v27 = vld [vmem:[%s1311_s0 + $0x74] ss:$8 sps:$4 sm:$0xff]   ;;  %v1074_v28 = vld [vmem:[%s1311_s0 + $0x70] ss:$8 sps:$4 sm:$0xff]   ;;  %v1077_v31 = vld [vmem:[%s1314_s3 + $0x8] sm:$0xff]  }
  0x23   :  { %270 = vmatprep.subr.bf16.mxu0 %v1105_v1  ;;  %v1075_v29 = vld [vmem:[%s1314_s3 + $0x18] sm:$0xff]   ;;  %v1076_v30 = vld [vmem:[%s1314_s3 + $0x10] sm:$0xff]   ;;  %v1078_v32 = vld [vmem:[%s1314_s3] sm:$0xff]  }
  0x24   :  { %987 = vmatprep.subr.bf16.mxu1 %v1075_v29  ;;  %v1079_v33 = vld [vmem:[%s1316_s5 + $0x18] sm:$0xff]   ;;  %v1259_v34 = vld [vmem:[%s1313_s2] ss:$0 sm:$0xff] }
  0x25   :  { %988 = vmatpush3.bf16.msra.mxu1 %v1075_v29 }
  0x26   :  { %271 = vmatpush2.bf16.msra.mxu0 %v1048_v11  ;;  %989 = vmatprep.subr.bf16.mxu1 %v1076_v30 }
  0x27   :  { %272 = vmatprep.subr.bf16.mxu0 %v1105_v1 }
  0x29   :  { %990 = vmatpush3.bf16.msra.mxu1 %v1076_v30 }
  0x2a   :  { %273 = vmatpush2.bf16.msra.mxu0 %v1049_v12  ;;  %991 = vmatprep.subr.bf16.mxu1 %v1077_v31 }
  0x2b   :  { %274 = vmatprep.subr.bf16.mxu0 %v1105_v1 }
  0x2d   :  { %992 = vmatpush3.bf16.msra.mxu1 %v1077_v31 }
  0x2e   :  { %275 = vmatpush2.bf16.msra.mxu0 %v1050_v13  ;;  %993 = vmatprep.subr.bf16.mxu1 %v1078_v32 }
  0x31   :  { %277 = vmatmul.mubr.bf16.vlgmr.msra.gmra.mxu0 %v1051_v14  ;;  %994 = vmatpush3.bf16.msra.mxu1 %v1078_v32 }
  0x32   :  { %851 = vmatprep.mubr.msk.bf16.mxu0 %vm219_vm0, %v1054_v15  ;;  %1011 = vmatprep.subr.bf16.mxu1 %v1079_v33 }
  0x39   :  { %285 = vmatmul.mubr.bf16.gmra.mxu0 %v1056_v16 }
  0x3a   :  { %852 = vmatprep.mubr.msk.bf16.mxu0 %vm219_vm0, %v1057_v17 }
  0x41   :  { %293 = vmatmul.mubr.bf16.gmra.mxu0 %v1059_v18 }
  0x42   :  { %853 = vmatprep.mubr.msk.bf16.mxu0 %vm219_vm0, %v1060_v19 }
  0x49   :  { %301 = vmatmul.mubr.bf16.gmra.mxu0 %v1062_v20 }
  0x4a   :  { %854 = vmatprep.mubr.msk.bf16.mxu0 %vm219_vm0, %v1063_v21 }
  0x51   :  { %309 = vmatmul.mubr.bf16.gmra.mxu0 %v1065_v22 }
  0x52   :  { %855 = vmatprep.mubr.msk.bf16.mxu0 %vm219_vm0, %v1066_v23 }
  0x59   :  { %317 = vmatmul.mubr.bf16.gmra.mxu0 %v1068_v24 }
  0x5a   :  { %856 = vmatprep.mubr.msk.bf16.mxu0 %vm219_vm0, %v1069_v25 }
  0x61   :  { %325 = vmatmul.mubr.bf16.gmra.mxu0 %v1071_v26 }
  0x62   :  { %857 = vmatprep.mubr.msk.bf16.mxu0 %vm219_vm0, %v1072_v27 }
  0x69   :  { %333 = vmatmul.mubr.bf16.gmra.mxu0 %v1074_v28 }
  0xf1   :  { %v278_v35 = vpop.f32.mrf.mxu0 }
  0xf2   :  { %v279_v37 = vadd.f32 %v1259_v34, %v278_v35 }
  0xf3   :  { %v280_v36 = vpop.f32.mrf.mxu0 }
  0xf4   :  { %v341_v41 = vmax.f32 %v279_v37, 0.0 }
  0xf5   :  { %v281_v38 = vpop.f32.mrf.mxu0 }
  0xf6   :  { %v282_v39 = vadd.f32 %v1259_v34, %v281_v38 }
  0xf7   :  { %v283_v40 = vpop.f32.mrf.mxu0 }
  0xf8   :  { %v342_v42 = vmax.f32 %v282_v39, 0.0 }
  0xf9   :  { %v286_v43 = vpop.f32.mrf.mxu0 }
  0xfa   :  { %v357_v44 = vpack.c.bf16 %v342_v42, %v341_v41  ;;  %v287_v46 = vadd.f32 %v1259_v34, %v286_v43 }
  0xfb   :  { %v288_v45 = vpop.f32.mrf.mxu0 }
  0xfc   :  { %995 = vmatprep.mubr.msk.bf16.mxu1 %vm219_vm0, %v357_v44  ;;  %v343_v50 = vmax.f32 %v287_v46, 0.0  ;;  %v1080_v44 = vld [vmem:[%s1316_s5 + $0x10] sm:$0xff]   ;;  %v1081_v45 = vld [vmem:[%s1316_s5 + $0x8] sm:$0xff]  }
  0xfd   :  { %v289_v47 = vpop.f32.mrf.mxu0 }
  0xfe   :  { %v290_v48 = vadd.f32 %v1259_v34, %v289_v47 }
  0xff   :  { %v291_v49 = vpop.f32.mrf.mxu0 }
 0x100   :  { %v344_v51 = vmax.f32 %v290_v48, 0.0  ;;  %v858_v48 = vld [vmem:[%s1315_s4] ss:$0 sm:$0xff] }
 0x101   :  { %v294_v52 = vpop.f32.mrf.mxu0 }
 0x102   :  { %v358_v53 = vpack.c.bf16 %v344_v51, %v343_v50  ;;  %v295_v55 = vadd.f32 %v1259_v34, %v294_v52 }
 0x103   :  { %v296_v54 = vpop.f32.mrf.mxu0 }
 0x104   :  { %996 = vmatmul.mubr.msk.bf16.vlgmr.msra.gmra.mxu1 %vm219_vm0, %v358_v53  ;;  %v345_v59 = vmax.f32 %v295_v55, 0.0 }
 0x105   :  { %v297_v56 = vpop.f32.mrf.mxu0  ;;  %1012 = vmatpush3.bf16.msra.mxu1 %v1079_v33 }
 0x106   :  { %v298_v57 = vadd.f32 %v1259_v34, %v297_v56  ;;  %1013 = vmatprep.subr.bf16.mxu1 %v1080_v44 }
 0x107   :  { %v299_v58 = vpop.f32.mrf.mxu0 }
 0x108   :  { %v346_v60 = vmax.f32 %v298_v57, 0.0 }
 0x109   :  { %v302_v61 = vpop.f32.mrf.mxu0  ;;  %1014 = vmatpush3.bf16.msra.mxu1 %v1080_v44 }
 0x10a   :  { %v359_v62 = vpack.c.bf16 %v346_v60, %v345_v59  ;;  %v303_v0 = vadd.f32 %v1259_v34, %v302_v61  ;;  %1015 = vmatprep.subr.bf16.mxu1 %v1081_v45 }
 0x10b   :  { %v304_v63 = vpop.f32.mrf.mxu0 }
 0x10c   :  { %999 = vmatprep.mubr.msk.bf16.mxu1 %vm219_vm0, %v359_v62  ;;  %v347_v4 = vmax.f32 %v303_v0, 0.0 }
 0x10d   :  { %v305_v1 = vpop.f32.mrf.mxu0  ;;  %1016 = vmatpush3.bf16.msra.mxu1 %v1081_v45 }
 0x10e   :  { %v306_v2 = vadd.f32 %v1259_v34, %v305_v1 }
 0x10f   :  { %v307_v3 = vpop.f32.mrf.mxu0 }
 0x110   :  { %v348_v5 = vmax.f32 %v306_v2, 0.0 }
 0x111   :  { %v310_v6 = vpop.f32.mrf.mxu0 }
 0x112   :  { %v360_v7 = vpack.c.bf16 %v348_v5, %v347_v4  ;;  %v311_v9 = vadd.f32 %v1259_v34, %v310_v6 }
 0x113   :  { %v312_v8 = vpop.f32.mrf.mxu0 }
 0x114   :  { %1000 = vmatmul.mubr.msk.bf16.gmra.mxu1 %vm219_vm0, %v360_v7  ;;  %v349_v13 = vmax.f32 %v311_v9, 0.0 }
 0x115   :  { %v313_v10 = vpop.f32.mrf.mxu0 }
 0x116   :  { %v314_v11 = vadd.f32 %v1259_v34, %v313_v10 }
 0x117   :  { %v315_v12 = vpop.f32.mrf.mxu0 }
 0x118   :  { %v350_v14 = vmax.f32 %v314_v11, 0.0 }
 0x119   :  { %v318_v15 = vpop.f32.mrf.mxu0 }
 0x11a   :  { %v361_v16 = vpack.c.bf16 %v350_v14, %v349_v13  ;;  %v319_v18 = vadd.f32 %v1259_v34, %v318_v15 }
 0x11b   :  { %v320_v17 = vpop.f32.mrf.mxu0 }
 0x11c   :  { %1003 = vmatprep.mubr.msk.bf16.mxu1 %vm219_vm0, %v361_v16  ;;  %v351_v22 = vmax.f32 %v319_v18, 0.0 }
 0x11d   :  { %v321_v19 = vpop.f32.mrf.mxu0 }
 0x11e   :  { %v322_v20 = vadd.f32 %v1259_v34, %v321_v19 }
 0x11f   :  { %v323_v21 = vpop.f32.mrf.mxu0 }
 0x120   :  { %v352_v23 = vmax.f32 %v322_v20, 0.0 }
 0x121   :  { %v326_v24 = vpop.f32.mrf.mxu0 }
 0x122   :  { %v362_v25 = vpack.c.bf16 %v352_v23, %v351_v22  ;;  %v327_v27 = vadd.f32 %v1259_v34, %v326_v24 }
 0x123   :  { %v328_v26 = vpop.f32.mrf.mxu0 }
 0x124   :  { %1004 = vmatmul.mubr.msk.bf16.gmra.mxu1 %vm219_vm0, %v362_v25  ;;  %v353_v31 = vmax.f32 %v327_v27, 0.0 }
 0x125   :  { %v329_v28 = vpop.f32.mrf.mxu0 }
 0x126   :  { %v330_v29 = vadd.f32 %v1259_v34, %v329_v28 }
 0x127   :  { %v331_v30 = vpop.f32.mrf.mxu0 }
 0x128   :  { %v354_v32 = vmax.f32 %v330_v29, 0.0 }
 0x129   :  { %v334_v33 = vpop.f32.mrf.mxu0 }
 0x12a   :  { %v363_v35 = vpack.c.bf16 %v354_v32, %v353_v31  ;;  %v335_v37 = vadd.f32 %v1259_v34, %v334_v33 }
 0x12b   :  { %v336_v36 = vpop.f32.mrf.mxu0 }
 0x12c   :  { %1007 = vmatprep.mubr.msk.bf16.mxu1 %vm219_vm0, %v363_v35  ;;  %v355_v41 = vmax.f32 %v335_v37, 0.0 }
 0x12d   :  { %v337_v38 = vpop.f32.mrf.mxu0 }
 0x12e   :  { %v338_v39 = vadd.f32 %v1259_v34, %v337_v38  ;;  %v1082_v34 = vld [vmem:[%s1316_s5] sm:$0xff]  }
 0x12f   :  { %v339_v40 = vpop.f32.mrf.mxu0  ;;  %1017 = vmatprep.subr.bf16.mxu1 %v1082_v34 }
 0x130   :  { %v356_v42 = vmax.f32 %v338_v39, 0.0  ;;  %1018 = vmatpush3.bf16.msra.mxu1 %v1082_v34 }
 0x132   :  { %v364_v43 = vpack.c.bf16 %v356_v42, %v355_v41  ;;  %v871_v41 = vld [vmem:[%s1317_s6] ss:$0 sm:$0xff]  ;;  %s1106_s6 = smov [#allocation2]  }
 0x133   :  { %s810_s26 = sshll.u32 %s1106_s6, 4  ;;  %s811_s26 = int_to_ptr.vmem [resolvable:$true] %s810_s26 }
 0x134   :  { %1008 = vmatmul.mubr.msk.bf16.gmra.mxu1 %vm219_vm0, %v364_v43  ;;  %s1083_s27 = scalar_lea.vmem %s811_s26, 1024  ;;  %p1088_p1 = scmp.lt.s32.totalorder %s811_s26, %s811_s26 }
 0x135   :  { %p1084_p0 = scmp.ne.s32.totalorder %s811_s26, %s1083_s27  ;;  %p1089_p2 = scmp.lt.s32.totalorder %s1083_s27, %s1083_s27 }
 0x137   :  { %p1090_p3 = por %p1089_p2, %p1088_p1 }
 0x139   :  { %p1091_p4 = pnand %p1090_p3, %p1084_p0 }
 0x1c4   :  { %v997_v46 = vpop.f32.mrf.mxu1 }
 0x1c5   :  { %v471_v52 = vadd.f32 %v997_v46, %v858_v48 }
 0x1c6   :  { %v462_v47 = vpop.f32.mrf.mxu1 }
 0x1c7   :  { %v463_v50 = vadd.f32 %v858_v48, %v462_v47  ;;  %v527_v58 = vmax.f32 %v471_v52, 0.0 }
 0x1c8   :  { %v998_v49 = vpop.f32.mrf.mxu1 }
 0x1c9   :  { %v474_v51 = vadd.f32 %v998_v49, %v858_v48  ;;  %v525_v56 = vmax.f32 %v463_v50, 0.0 }
 0x1ca   :  { %v465_v53 = vpop.f32.mrf.mxu1 }
 0x1cb   :  { %v466_v54 = vadd.f32 %v858_v48, %v465_v53  ;;  %v528_v55 = vmax.f32 %v474_v51, 0.0 }
 0x1cd   :  { %v526_v57 = vmax.f32 %v466_v54, 0.0  ;;  %v542_v60 = vpack.c.bf16 %v528_v55, %v527_v58 }
 0x1cf   :  { %v541_v59 = vpack.c.bf16 %v526_v57, %v525_v56 }
 0x1d1   :  { %1019 = vmatprep.mubr.msk.bf16.mxu1 %vm219_vm0, %v541_v59 }
 0x1d2   :  { %1020 = vmatmul.mubr.msk.bf16.vlgmr.msra.gmra.mxu1 %vm219_vm0, %v542_v60 }
 0x1d4   :  { %v1001_v61 = vpop.f32.mrf.mxu1 }
 0x1d5   :  { %v487_v2 = vadd.f32 %v1001_v61, %v858_v48 }
 0x1d6   :  { %v478_v62 = vpop.f32.mrf.mxu1 }
 0x1d7   :  { %v479_v0 = vadd.f32 %v858_v48, %v478_v62  ;;  %v531_v8 = vmax.f32 %v487_v2, 0.0 }
 0x1d8   :  { %v1002_v63 = vpop.f32.mrf.mxu1 }
 0x1d9   :  { %v490_v1 = vadd.f32 %v1002_v63, %v858_v48  ;;  %v529_v6 = vmax.f32 %v479_v0, 0.0 }
 0x1da   :  { %v481_v3 = vpop.f32.mrf.mxu1 }
 0x1db   :  { %v482_v4 = vadd.f32 %v858_v48, %v481_v3  ;;  %v532_v5 = vmax.f32 %v490_v1, 0.0 }
 0x1dd   :  { %v530_v7 = vmax.f32 %v482_v4, 0.0  ;;  %v544_v10 = vpack.c.bf16 %v532_v5, %v531_v8 }
 0x1df   :  { %v543_v9 = vpack.c.bf16 %v530_v7, %v529_v6 }
 0x1e1   :  { %1023 = vmatprep.mubr.msk.bf16.mxu1 %vm219_vm0, %v543_v9 }
 0x1e2   :  { %1024 = vmatmul.mubr.msk.bf16.gmra.mxu1 %vm219_vm0, %v544_v10 }
 0x1e4   :  { %v1005_v11 = vpop.f32.mrf.mxu1 }
 0x1e5   :  { %v503_v16 = vadd.f32 %v1005_v11, %v858_v48 }
 0x1e6   :  { %v494_v12 = vpop.f32.mrf.mxu1 }
 0x1e7   :  { %v495_v14 = vadd.f32 %v858_v48, %v494_v12  ;;  %v535_v22 = vmax.f32 %v503_v16, 0.0 }
 0x1e8   :  { %v1006_v13 = vpop.f32.mrf.mxu1 }
 0x1e9   :  { %v506_v15 = vadd.f32 %v1006_v13, %v858_v48  ;;  %v533_v20 = vmax.f32 %v495_v14, 0.0 }
 0x1ea   :  { %v497_v17 = vpop.f32.mrf.mxu1 }
 0x1eb   :  { %v498_v18 = vadd.f32 %v858_v48, %v497_v17  ;;  %v536_v19 = vmax.f32 %v506_v15, 0.0 }
 0x1ed   :  { %v534_v21 = vmax.f32 %v498_v18, 0.0  ;;  %v546_v24 = vpack.c.bf16 %v536_v19, %v535_v22 }
 0x1ef   :  { %v545_v23 = vpack.c.bf16 %v534_v21, %v533_v20 }
 0x1f1   :  { %1027 = vmatprep.mubr.msk.bf16.mxu1 %vm219_vm0, %v545_v23 }
 0x1f2   :  { %1028 = vmatmul.mubr.msk.bf16.gmra.mxu1 %vm219_vm0, %v546_v24 }
 0x1f4   :  { %v1009_v25 = vpop.f32.mrf.mxu1 }
 0x1f5   :  { %v519_v30 = vadd.f32 %v1009_v25, %v858_v48 }
 0x1f6   :  { %v510_v26 = vpop.f32.mrf.mxu1 }
 0x1f7   :  { %v511_v28 = vadd.f32 %v858_v48, %v510_v26  ;;  %v539_v37 = vmax.f32 %v519_v30, 0.0 }
 0x1f8   :  { %v1010_v27 = vpop.f32.mrf.mxu1 }
 0x1f9   :  { %v522_v29 = vadd.f32 %v1010_v27, %v858_v48  ;;  %v537_v35 = vmax.f32 %v511_v28, 0.0 }
 0x1fa   :  { %v513_v31 = vpop.f32.mrf.mxu1 }
 0x1fb   :  { %v514_v32 = vadd.f32 %v858_v48, %v513_v31  ;;  %v540_v33 = vmax.f32 %v522_v29, 0.0 }
 0x1fd   :  { %v538_v36 = vmax.f32 %v514_v32, 0.0  ;;  %v548_v39 = vpack.c.bf16 %v540_v33, %v539_v37 }
 0x1ff   :  { %v547_v38 = vpack.c.bf16 %v538_v36, %v537_v35 }
 0x201   :  { %1031 = vmatprep.mubr.msk.bf16.mxu1 %vm219_vm0, %v547_v38 }
 0x202   :  { %1032 = vmatmul.mubr.msk.bf16.gmra.mxu1 %vm219_vm0, %v548_v39 }
 0x292   :  { %v1021_v40 = vpop.f32.mrf.mxu1 }
 0x293   :  { %v655_v43 = vadd.f32 %v1021_v40, %v871_v41 }
 0x294   :  { %v646_v42 = vpop.f32.mrf.mxu1 }
 0x295   :  { %v647_v45 = vadd.f32 %v871_v41, %v646_v42  ;;  %v711_v47 = vmax.f32 %v655_v43, 0.0 }
 0x296   :  { %v1022_v44 = vpop.f32.mrf.mxu1 }
 0x297   :  { %v658_v34 = vadd.f32 %v1022_v44, %v871_v41  ;;  %v709_v50 = vmax.f32 %v647_v45, 0.0 }
 0x298   :  { %v649_v46 = vpop.f32.mrf.mxu1 }
 0x299   :  { %v712_v48 = vmax.f32 %v658_v34, 0.0  ;;  %v650_v49 = vadd.f32 %v871_v41, %v649_v46 }
 0x29b   :  { %v924_v51 = vpack.c.bf16 %v712_v48, %v711_v47  ;;  %v710_v52 = vmax.f32 %v650_v49, 0.0 }
 0x29d   :  { %956 = vst [vmem:[#allocation2 + $0x8] sm:$0xff] %v924_v51   ;;  %v919_v53 = vpack.c.bf16 %v710_v52, %v709_v50 }
 0x29f   :  { %920 = vst [vmem:[#allocation2] sm:$0xff] %v919_v53  }
 0x2a2   :  { %v1025_v54 = vpop.f32.mrf.mxu1 }
 0x2a3   :  { %v671_v56 = vadd.f32 %v1025_v54, %v871_v41 }
 0x2a4   :  { %v662_v55 = vpop.f32.mrf.mxu1 }
 0x2a5   :  { %v663_v58 = vadd.f32 %v871_v41, %v662_v55  ;;  %v715_v61 = vmax.f32 %v671_v56, 0.0 }
 0x2a6   :  { %v1026_v57 = vpop.f32.mrf.mxu1 }
 0x2a7   :  { %v674_v59 = vadd.f32 %v1026_v57, %v871_v41  ;;  %v713_v0 = vmax.f32 %v663_v58, 0.0 }
 0x2a8   :  { %v665_v60 = vpop.f32.mrf.mxu1 }
 0x2a9   :  { %v716_v62 = vmax.f32 %v674_v59, 0.0  ;;  %v666_v63 = vadd.f32 %v871_v41, %v665_v60 }
 0x2ab   :  { %v934_v1 = vpack.c.bf16 %v716_v62, %v715_v61  ;;  %v714_v2 = vmax.f32 %v666_v63, 0.0 }
 0x2ad   :  { %958 = vst [vmem:[#allocation2 + $0x18] sm:$0xff] %v934_v1   ;;  %v929_v3 = vpack.c.bf16 %v714_v2, %v713_v0 }
 0x2af   :  { %957 = vst [vmem:[#allocation2 + $0x10] sm:$0xff] %v929_v3  }
 0x2b2   :  { %v1029_v4 = vpop.f32.mrf.mxu1 }
 0x2b3   :  { %v687_v6 = vadd.f32 %v1029_v4, %v871_v41 }
 0x2b4   :  { %v678_v5 = vpop.f32.mrf.mxu1 }
 0x2b5   :  { %v679_v8 = vadd.f32 %v871_v41, %v678_v5  ;;  %v719_v11 = vmax.f32 %v687_v6, 0.0 }
 0x2b6   :  { %v1030_v7 = vpop.f32.mrf.mxu1 }
 0x2b7   :  { %v690_v9 = vadd.f32 %v1030_v7, %v871_v41  ;;  %v717_v14 = vmax.f32 %v679_v8, 0.0 }
 0x2b8   :  { %v681_v10 = vpop.f32.mrf.mxu1 }
 0x2b9   :  { %v720_v12 = vmax.f32 %v690_v9, 0.0  ;;  %v682_v13 = vadd.f32 %v871_v41, %v681_v10 }
 0x2bb   :  { %v944_v15 = vpack.c.bf16 %v720_v12, %v719_v11  ;;  %v718_v16 = vmax.f32 %v682_v13, 0.0 }
 0x2bd   :  { %960 = vst [vmem:[#allocation2 + $0x28] sm:$0xff] %v944_v15   ;;  %v939_v17 = vpack.c.bf16 %v718_v16, %v717_v14 }
 0x2bf   :  { %959 = vst [vmem:[#allocation2 + $0x20] sm:$0xff] %v939_v17  }
 0x2c2   :  { %v1033_v18 = vpop.f32.mrf.mxu1 }
 0x2c3   :  { %v703_v20 = vadd.f32 %v1033_v18, %v871_v41 }
 0x2c4   :  { %v694_v19 = vpop.f32.mrf.mxu1 }
 0x2c5   :  { %v695_v22 = vadd.f32 %v871_v41, %v694_v19  ;;  %v723_v25 = vmax.f32 %v703_v20, 0.0 }
 0x2c6   :  { %v1034_v21 = vpop.f32.mrf.mxu1 }
 0x2c7   :  { %v706_v23 = vadd.f32 %v1034_v21, %v871_v41  ;;  %v721_v28 = vmax.f32 %v695_v22, 0.0 }
 0x2c8   :  { %v697_v24 = vpop.f32.mrf.mxu1 }
 0x2c9   :  { %v724_v26 = vmax.f32 %v706_v23, 0.0  ;;  %v698_v27 = vadd.f32 %v871_v41, %v697_v24 }
 0x2cb   :  { %v954_v29 = vpack.c.bf16 %v724_v26, %v723_v25  ;;  %v722_v30 = vmax.f32 %v698_v27, 0.0 }
 0x2cd   :  { %962 = vst [vmem:[#allocation2 + $0x38] sm:$0xff] %v954_v29   ;;  %v949_v31 = vpack.c.bf16 %v722_v30, %v721_v28 }
 0x2cf   :  { %961 = vst [vmem:[#allocation2 + $0x30] sm:$0xff] %v949_v31  }
 0x2d0   :  { %1094 = shalt.err (!%p1091_p4)
}
 0x2d1   :  { %s1107_s28 = smov 64   ;;  %s1108_s29 = smov 4  }
 0x2d2   :  { %816 = dma.vmem_to_hbm [thread:$0]  %s811_s26, 1024, %s1318_s7, [#allocation3], %s1107_s28, %s1107_s28, %s1108_s29  }
 0x2d3   :  { %1103 = dma.done.wait [#allocation3], 1024  }
 0x2d4   :  { %1104 = vsyncadd [#allocation3], 4294966272 }
 0x2d5   :  { %820 = vsyncpa [#allocation3], 1 }

</bundles_post_ra>
